<compile_context>
chip_gen: v5e
topology: v5e:2x2
jax: 0.10.0
libtpu: 0.0.40
codegen_flags: <defaults>
</compile_context>

<pallas_src>
import numpy as np
import jax
import jax.numpy as jnp
from jax.experimental import pallas as pl
from jax.experimental.pallas import tpu as pltpu

CODE_SIZE = 72
SLICE_SHAPE = (12, 12, 3, 3)
SLICE_ELEMS = 12 * 12 * 3 * 3  # 1296
EPS = 1e-5                     # nn.BatchNorm2d default eps


# ----------------------------------------------------------------------------
# Fused bottleneck kernel:  bn1+relu -> 1x1 conv -> bn2+relu -> 3x3 conv
# Layout: channels on sublanes, H*W pixels on lanes (NCHW-native).
# ----------------------------------------------------------------------------
def make_bottleneck_kernel(Nb, H, W, Cin, Cmid, Cout):
    HW = H * W

    def kernel(x_ref, s1_ref, b1_ref, w1_ref, b2_ref, k2_ref, m_ref, o_ref):
        # Static unroll over the images of this batch tile (Nb is kept small).
        for n in range(Nb):
            x = x_ref[n]                                            # (Cin, HW) f32

            # bn1 (pre-folded scale/shift) + relu
            a = jnp.maximum(x * s1_ref[...] + b1_ref[...], 0.0)

            # 1x1 conv (bn2 scale pre-folded into the weight rows): one MXU pass
            y = jnp.dot(w1_ref[...], a.astype(jnp.bfloat16),
                        preferred_element_type=jnp.float32)         # (Cmid, HW)

            # bn2 shift + relu, bf16 operand for the 3x3 matmuls
            b = jnp.maximum(y + b2_ref[...], 0.0).astype(jnp.bfloat16)

            # 3x3 conv = 9 tap matmuls on the unshifted activation; the shift is
            # applied to the small (Cout, HW) tap result and invalid (padding)
            # positions are zeroed with a precomputed mask.
            # center tap (dh=1, dw=1): no shift, no mask -> initializes acc
            acc = jnp.dot(k2_ref[4], b, preferred_element_type=jnp.float32)
            for t in range(9):
                if t == 4:
                    continue
                dh, dw = divmod(t, 3)
                delta = (dh - 1) * W + (dw - 1)
                u = jnp.dot(k2_ref[t], b,
                            preferred_element_type=jnp.float32)     # (Cout, HW)
                # out[p] += u[p + delta] for valid p  (roll by -delta, then mask)
                u = jnp.roll(u, -delta, axis=1)
                acc = acc + u * m_ref[t]

            # Write the already-concatenated [conv_out ; x] block (NCHW-native).
            o_ref[n, 0:Cout, :] = acc.astype(o_ref.dtype)
            o_ref[n, Cout:Cout + Cin, :] = x.astype(o_ref.dtype)

    return kernel


def bottleneck_forward(x_nchw, params, images_per_step=None):
    """Pallas forward. Input/output are NCHW (PyTorch convention)."""
    N, Cin, H, W = x_nchw.shape
    Cmid = params["w1_oihw"].shape[0]        # 4 * growth_rate
    Cout = int(params["growth_rate"])
    HW = H * W
    Ctot = Cout + Cin

    # ---- x-independent preprocessing (plain JAX, outside the hot path) ----
    s1 = params["g1"] * jax.lax.rsqrt(params["v1"] + EPS)
    b1f = params["b1"] - params["m1"] * s1
    s2 = params["g2"] * jax.lax.rsqrt(params["v2"] + EPS)
    b2f = params["b2"] - params["m2"] * s2

    w1_mat = params["w1_oihw"][:, :, 0, 0]                           # (Cmid, Cin)
    w1s = (w1_mat * s2[:, None]).astype(jnp.bfloat16)                # bn2 scale folded

    # CSG -> kernel2 (mirrors the module's view/slice).
    slices = jnp.dot(params["code2"], params["gen"],
                     precision=jax.lax.Precision.HIGHEST)
    out_rows = int(np.ceil(Cout / SLICE_SHAPE[0]) * SLICE_SHAPE[0])
    in_cols = int(np.ceil(Cmid / SLICE_SHAPE[1]) * SLICE_SHAPE[1])
    k2_oihw = slices.reshape(out_rows, in_cols, 3, 3)[:Cout, :Cmid, :, :]
    k2_taps = jnp.transpose(k2_oihw, (2, 3, 0, 1)).reshape(9, Cout, Cmid)
    k2_taps = k2_taps.astype(jnp.bfloat16)                           # (9, Cout, Cmid)

    # Per-tap validity masks in output coordinates (host-side constants).
    hh, ww = np.meshgrid(np.arange(H), np.arange(W), indexing="ij")
    masks = []
    for dh in range(3):
        for dw in range(3):
            valid = ((hh + dh - 1 >= 0) & (hh + dh - 1 < H)
                     & (ww + dw - 1 >= 0) & (ww + dw - 1 < W))
            masks.append(valid.reshape(1, HW))
    tap_mask = jnp.asarray(np.stack(masks, 0).astype(np.float32))    # (9, 1, HW)

    # NCHW is already channels-on-sublane / pixels-on-lane: this reshape is free.
    x3 = x_nchw.astype(jnp.float32).reshape(N, Cin, HW)

    # ---- per-step batch tile: bounded VMEM, >=2 grid steps when possible ----
    per_img = (2 * Cin * HW * 4          # x block (double-buffered)
               + 2 * Ctot * HW * 4       # output block (double-buffered)
               + Cin * HW * 6            # bn1 activation (f32 + bf16 copy)
               + Cmid * HW * 6           # conv1 output (f32) + bf16 copy
               + 4 * Cout * HW * 4)      # tap results / rolled copies / acc
    if images_per_step is None:
        cap = max(1, min(8, (12 << 20) // max(per_img, 1)))
        if N >= 2:
            cap = min(cap, max(1, N // 2))   # keep >= 2 grid steps (v7x megacore)
        Nb = 1
        for nb in range(min(cap, N), 0, -1):
            if N % nb == 0:
                Nb = nb
                break
    else:
        Nb = int(images_per_step)
        if Nb <= 0 or N % Nb != 0:
            Nb = 1
    steps = N // Nb

    vmem_limit = int(min(64 << 20, max(24 << 20, 2 * per_img * Nb)))

    kernel = make_bottleneck_kernel(Nb, H, W, Cin, Cmid, Cout)
    out3 = pl.pallas_call(
        kernel,
        out_shape=jax.ShapeDtypeStruct((N, Ctot, HW), jnp.float32),
        grid=(steps,),
        in_specs=[
            pl.BlockSpec((Nb, Cin, HW), lambda n: (n, 0, 0)),        # x (NC,HW)
            pl.BlockSpec((Cin, 1), lambda n: (0, 0)),                # bn1 scale
            pl.BlockSpec((Cin, 1), lambda n: (0, 0)),                # bn1 shift
            pl.BlockSpec((Cmid, Cin), lambda n: (0, 0)),             # w1 * s2 (bf16)
            pl.BlockSpec((Cmid, 1), lambda n: (0, 0)),               # bn2 shift
            pl.BlockSpec((9, Cout, Cmid), lambda n: (0, 0, 0)),      # k2 taps (bf16)
            pl.BlockSpec((9, 1, HW), lambda n: (0, 0, 0)),           # tap masks
        ],
        out_specs=pl.BlockSpec((Nb, Ctot, HW), lambda n: (n, 0, 0)),
        compiler_params=pltpu.CompilerParams(
            dimension_semantics=("parallel",),
            vmem_limit_bytes=vmem_limit),
    )(x3, s1.reshape(Cin, 1), b1f.reshape(Cin, 1), w1s,
      b2f.reshape(Cmid, 1), k2_taps, tap_mask)

    return out3.reshape(N, Ctot, H, W)                               # NCHW, free


# ----------------------------------------------------------------------------
# Pure-JAX reference (mirrors the PyTorch module, NCHW, f32) for verification.
# ----------------------------------------------------------------------------
def reference_forward(x_nchw, params):
    Cmid = params["w1_oihw"].shape[0]
    Cout = int(params["growth_rate"])

    def bn(x, g, b, m, v):
        g = g[None, :, None, None]
        b = b[None, :, None, None]
        m = m[None, :, None, None]
        v = v[None, :, None, None]
        return (x - m) * (g / jnp.sqrt(v + EPS)) + b

    a = jax.nn.relu(bn(x_nchw, params["g1"], params["b1"], params["m1"], params["v1"]))
    y = jax.lax.conv_general_dilated(
        a, params["w1_oihw"], (1, 1), "VALID",
        dimension_numbers=("NCHW", "OIHW", "NCHW"),
        precision=jax.lax.Precision.HIGHEST)

    slices = jnp.dot(params["code2"], params["gen"],
                     precision=jax.lax.Precision.HIGHEST)
    out_rows = int(np.ceil(Cout / SLICE_SHAPE[0]) * SLICE_SHAPE[0])
    in_cols = int(np.ceil(Cmid / SLICE_SHAPE[1]) * SLICE_SHAPE[1])
    k2 = slices.reshape(out_rows, in_cols, 3, 3)[:Cout, :Cmid, :, :]

    b2 = jax.nn.relu(bn(y, params["g2"], params["b2"], params["m2"], params["v2"]))
    z = jax.lax.conv_general_dilated(
        b2, k2, (1, 1), ((1, 1), (1, 1)),
        dimension_numbers=("NCHW", "OIHW", "NCHW"),
        precision=jax.lax.Precision.HIGHEST)
    return jnp.concatenate([z, x_nchw], axis=1)


if __name__ == "__main__":
    # Shapes consistent with the module:
    #   in_planes=16, growth_rate=12 -> Cmid=48, Cout=12, num_slices=4
    N, in_planes, H, W = 2, 16, 16, 16
    growth_rate = 12
    Cmid = 4 * growth_rate
    Cout = growth_rate
    # Matches Bottleneck.__init__ exactly (works because SLICE_SHAPE is square).
    num_slices = int(np.ceil(Cmid / SLICE_SHAPE[0]) * np.ceil(Cout / SLICE_SHAPE[1]))

    key = jax.random.PRNGKey(0)
    keys = jax.random.split(key, 12)

    params = {
        "growth_rate": growth_rate,
        # bn1
        "g1": jax.random.uniform(keys[0], (in_planes,), jnp.float32, 0.5, 1.5),
        "b1": 0.1 * jax.random.normal(keys[1], (in_planes,), jnp.float32),
        "m1": 0.1 * jax.random.normal(keys[2], (in_planes,), jnp.float32),
        "v1": jax.random.uniform(keys[3], (in_planes,), jnp.float32, 0.5, 1.5),
        # conv1 (1x1), OIHW
        "w1_oihw": (jax.random.normal(keys[4], (Cmid, in_planes, 1, 1), jnp.float32)
                    / np.sqrt(in_planes)),
        # bn2
        "g2": jax.random.uniform(keys[5], (Cmid,), jnp.float32, 0.5, 1.5),
        "b2": 0.1 * jax.random.normal(keys[6], (Cmid,), jnp.float32),
        "m2": 0.1 * jax.random.normal(keys[7], (Cmid,), jnp.float32),
        "v2": jax.random.uniform(keys[8], (Cmid,), jnp.float32, 0.5, 1.5),
        # CSG code + deterministic linear generator
        "code2": jax.random.normal(keys[9], (num_slices, CODE_SIZE), jnp.float32),
        "gen": (jax.random.normal(keys[10], (CODE_SIZE, SLICE_ELEMS), jnp.float32)
                / np.sqrt(CODE_SIZE * 9 * Cmid)),
    }

    x = jax.random.normal(keys[11], (N, in_planes, H, W), jnp.float32)

    out = jax.block_until_ready(bottleneck_forward(x, params))
    ref = jax.block_until_ready(reference_forward(x, params))

    assert out.shape == (N, Cout + in_planes, H, W), out.shape
    # Tolerance accounts for bf16 MXU operands (f32 accumulation) in the kernel
    # vs the f32-HIGHEST reference.
    err = float(np.max(np.abs(np.asarray(out) - np.asarray(ref))))
    assert np.allclose(np.asarray(out), np.asarray(ref), atol=3e-2, rtol=3e-2), err

    print("KERNEL_OK")
</pallas_src>

<mosaic_0001>
module attributes {stable_mosaic.version = 11 : i64} {
  func.func @kernel(%arg0: i32, %arg1: memref<1x16x256xf32, #tpu.memory_space<vmem>>, %arg2: memref<16x1xf32, #tpu.memory_space<vmem>>, %arg3: memref<16x1xf32, #tpu.memory_space<vmem>>, %arg4: memref<48x16xbf16, #tpu.memory_space<vmem>>, %arg5: memref<48x1xf32, #tpu.memory_space<vmem>>, %arg6: memref<9x12x48xbf16, #tpu.memory_space<vmem>>, %arg7: memref<9x1x256xf32, #tpu.memory_space<vmem>>, %arg8: memref<1x28x256xf32, #tpu.memory_space<vmem>>) attributes {dimension_semantics = [#tpu.dimension_semantics<parallel>], iteration_bounds = array<i64: 2>, scalar_prefetch = 0 : i64, scratch_operands = 0 : i64, tpu.core_type = #tpu.core_type<tc>, window_params = [{transform_indices = @transform_0, window_bounds = array<i64: 1, 16, 256>}, {pipeline_mode = #tpu.pipeline_mode<synchronous>, transform_indices = @transform_1, window_bounds = array<i64: 16, 1>}, {pipeline_mode = #tpu.pipeline_mode<synchronous>, transform_indices = @transform_2, window_bounds = array<i64: 16, 1>}, {pipeline_mode = #tpu.pipeline_mode<synchronous>, transform_indices = @transform_3, window_bounds = array<i64: 48, 16>}, {pipeline_mode = #tpu.pipeline_mode<synchronous>, transform_indices = @transform_4, window_bounds = array<i64: 48, 1>}, {pipeline_mode = #tpu.pipeline_mode<synchronous>, transform_indices = @transform_5, window_bounds = array<i64: 9, 12, 48>}, {pipeline_mode = #tpu.pipeline_mode<synchronous>, transform_indices = @transform_6, window_bounds = array<i64: 9, 1, 256>}, {transform_indices = @transform_7, window_bounds = array<i64: 1, 28, 256>}]} {
    %c0 = arith.constant 0 : index
    %c0_0 = arith.constant 0 : index
    %c0_1 = arith.constant 0 : index
    %0 = vector.load %arg1[%c0, %c0_0, %c0_1] : memref<1x16x256xf32, #tpu.memory_space<vmem>>, vector<1x16x256xf32>
    %1 = vector.shape_cast %0 : vector<1x16x256xf32> to vector<16x256xf32>
    %c0_2 = arith.constant 0 : index
    %c0_3 = arith.constant 0 : index
    %2 = vector.load %arg2[%c0_2, %c0_3] : memref<16x1xf32, #tpu.memory_space<vmem>>, vector<16x1xf32>
    %3 = vector.broadcast %2 : vector<16x1xf32> to vector<16x256xf32>
    %4 = arith.mulf %1, %3 : vector<16x256xf32>
    %c0_4 = arith.constant 0 : index
    %c0_5 = arith.constant 0 : index
    %5 = vector.load %arg3[%c0_4, %c0_5] : memref<16x1xf32, #tpu.memory_space<vmem>>, vector<16x1xf32>
    %6 = vector.broadcast %5 : vector<16x1xf32> to vector<16x256xf32>
    %7 = arith.addf %4, %6 : vector<16x256xf32>
    %cst = arith.constant 0.000000e+00 : f32
    %8 = vector.broadcast %cst : f32 to vector<16x256xf32>
    %9 = arith.maximumf %7, %8 : vector<16x256xf32>
    %c0_6 = arith.constant 0 : index
    %c0_7 = arith.constant 0 : index
    %10 = vector.load %arg4[%c0_6, %c0_7] : memref<48x16xbf16, #tpu.memory_space<vmem>>, vector<48x16xbf16>
    %11 = arith.truncf %9 : vector<16x256xf32> to vector<16x256xbf16>
    %cst_8 = arith.constant dense<0.000000e+00> : vector<48x256xf32>
    %12 = tpu.matmul %10, %11, %cst_8 {dimension_numbers = #tpu.dot_dimension_numbers<[1], [0], [0], [1], [0, 0, 1, 1], [], []>} : vector<48x16xbf16>, vector<16x256xbf16>, vector<48x256xf32> -> vector<48x256xf32>
    %c0_9 = arith.constant 0 : index
    %c0_10 = arith.constant 0 : index
    %13 = vector.load %arg5[%c0_9, %c0_10] : memref<48x1xf32, #tpu.memory_space<vmem>>, vector<48x1xf32>
    %14 = vector.broadcast %13 : vector<48x1xf32> to vector<48x256xf32>
    %15 = arith.addf %12, %14 : vector<48x256xf32>
    %cst_11 = arith.constant 0.000000e+00 : f32
    %16 = vector.broadcast %cst_11 : f32 to vector<48x256xf32>
    %17 = arith.maximumf %15, %16 : vector<48x256xf32>
    %18 = arith.truncf %17 : vector<48x256xf32> to vector<48x256xbf16>
    %c4 = arith.constant 4 : index
    %c0_12 = arith.constant 0 : index
    %c0_13 = arith.constant 0 : index
    %19 = vector.load %arg6[%c4, %c0_12, %c0_13] : memref<9x12x48xbf16, #tpu.memory_space<vmem>>, vector<1x12x48xbf16>
    %20 = vector.shape_cast %19 : vector<1x12x48xbf16> to vector<12x48xbf16>
    %cst_14 = arith.constant dense<0.000000e+00> : vector<12x256xf32>
    %21 = tpu.matmul %20, %18, %cst_14 {dimension_numbers = #tpu.dot_dimension_numbers<[1], [0], [0], [1], [0, 0, 1, 1], [], []>} : vector<12x48xbf16>, vector<48x256xbf16>, vector<12x256xf32> -> vector<12x256xf32>
    %c0_15 = arith.constant 0 : index
    %c0_16 = arith.constant 0 : index
    %c0_17 = arith.constant 0 : index
    %22 = vector.load %arg6[%c0_15, %c0_16, %c0_17] : memref<9x12x48xbf16, #tpu.memory_space<vmem>>, vector<1x12x48xbf16>
    %23 = vector.shape_cast %22 : vector<1x12x48xbf16> to vector<12x48xbf16>
    %cst_18 = arith.constant dense<0.000000e+00> : vector<12x256xf32>
    %24 = tpu.matmul %23, %18, %cst_18 {dimension_numbers = #tpu.dot_dimension_numbers<[1], [0], [0], [1], [0, 0, 1, 1], [], []>} : vector<12x48xbf16>, vector<48x256xbf16>, vector<12x256xf32> -> vector<12x256xf32>
    %25 = vector.extract_strided_slice %24 {offsets = [0, 239], sizes = [12, 17], strides = [1, 1]} : vector<12x256xf32> to vector<12x17xf32>
    %26 = vector.extract_strided_slice %24 {offsets = [0, 0], sizes = [12, 239], strides = [1, 1]} : vector<12x256xf32> to vector<12x239xf32>
    %27 = tpu.concatenate %25, %26 in 1 : vector<12x17xf32>, vector<12x239xf32> -> vector<12x256xf32>
    %c0_19 = arith.constant 0 : index
    %c0_20 = arith.constant 0 : index
    %c0_21 = arith.constant 0 : index
    %28 = vector.load %arg7[%c0_19, %c0_20, %c0_21] : memref<9x1x256xf32, #tpu.memory_space<vmem>>, vector<1x1x256xf32>
    %29 = vector.shape_cast %28 : vector<1x1x256xf32> to vector<1x256xf32>
    %30 = vector.broadcast %29 : vector<1x256xf32> to vector<12x256xf32>
    %31 = arith.mulf %27, %30 : vector<12x256xf32>
    %32 = arith.addf %21, %31 : vector<12x256xf32>
    %c1 = arith.constant 1 : index
    %c0_22 = arith.constant 0 : index
    %c0_23 = arith.constant 0 : index
    %33 = vector.load %arg6[%c1, %c0_22, %c0_23] : memref<9x12x48xbf16, #tpu.memory_space<vmem>>, vector<1x12x48xbf16>
    %34 = vector.shape_cast %33 : vector<1x12x48xbf16> to vector<12x48xbf16>
    %cst_24 = arith.constant dense<0.000000e+00> : vector<12x256xf32>
    %35 = tpu.matmul %34, %18, %cst_24 {dimension_numbers = #tpu.dot_dimension_numbers<[1], [0], [0], [1], [0, 0, 1, 1], [], []>} : vector<12x48xbf16>, vector<48x256xbf16>, vector<12x256xf32> -> vector<12x256xf32>
    %36 = vector.extract_strided_slice %35 {offsets = [0, 240], sizes = [12, 16], strides = [1, 1]} : vector<12x256xf32> to vector<12x16xf32>
    %37 = vector.extract_strided_slice %35 {offsets = [0, 0], sizes = [12, 240], strides = [1, 1]} : vector<12x256xf32> to vector<12x240xf32>
    %38 = tpu.concatenate %36, %37 in 1 : vector<12x16xf32>, vector<12x240xf32> -> vector<12x256xf32>
    %c1_25 = arith.constant 1 : index
    %c0_26 = arith.constant 0 : index
    %c0_27 = arith.constant 0 : index
    %39 = vector.load %arg7[%c1_25, %c0_26, %c0_27] : memref<9x1x256xf32, #tpu.memory_space<vmem>>, vector<1x1x256xf32>
    %40 = vector.shape_cast %39 : vector<1x1x256xf32> to vector<1x256xf32>
    %41 = vector.broadcast %40 : vector<1x256xf32> to vector<12x256xf32>
    %42 = arith.mulf %38, %41 : vector<12x256xf32>
    %43 = arith.addf %32, %42 : vector<12x256xf32>
    %c2 = arith.constant 2 : index
    %c0_28 = arith.constant 0 : index
    %c0_29 = arith.constant 0 : index
    %44 = vector.load %arg6[%c2, %c0_28, %c0_29] : memref<9x12x48xbf16, #tpu.memory_space<vmem>>, vector<1x12x48xbf16>
    %45 = vector.shape_cast %44 : vector<1x12x48xbf16> to vector<12x48xbf16>
    %cst_30 = arith.constant dense<0.000000e+00> : vector<12x256xf32>
    %46 = tpu.matmul %45, %18, %cst_30 {dimension_numbers = #tpu.dot_dimension_numbers<[1], [0], [0], [1], [0, 0, 1, 1], [], []>} : vector<12x48xbf16>, vector<48x256xbf16>, vector<12x256xf32> -> vector<12x256xf32>
    %47 = vector.extract_strided_slice %46 {offsets = [0, 241], sizes = [12, 15], strides = [1, 1]} : vector<12x256xf32> to vector<12x15xf32>
    %48 = vector.extract_strided_slice %46 {offsets = [0, 0], sizes = [12, 241], strides = [1, 1]} : vector<12x256xf32> to vector<12x241xf32>
    %49 = tpu.concatenate %47, %48 in 1 : vector<12x15xf32>, vector<12x241xf32> -> vector<12x256xf32>
    %c2_31 = arith.constant 2 : index
    %c0_32 = arith.constant 0 : index
    %c0_33 = arith.constant 0 : index
    %50 = vector.load %arg7[%c2_31, %c0_32, %c0_33] : memref<9x1x256xf32, #tpu.memory_space<vmem>>, vector<1x1x256xf32>
    %51 = vector.shape_cast %50 : vector<1x1x256xf32> to vector<1x256xf32>
    %52 = vector.broadcast %51 : vector<1x256xf32> to vector<12x256xf32>
    %53 = arith.mulf %49, %52 : vector<12x256xf32>
    %54 = arith.addf %43, %53 : vector<12x256xf32>
    %c3 = arith.constant 3 : index
    %c0_34 = arith.constant 0 : index
    %c0_35 = arith.constant 0 : index
    %55 = vector.load %arg6[%c3, %c0_34, %c0_35] : memref<9x12x48xbf16, #tpu.memory_space<vmem>>, vector<1x12x48xbf16>
    %56 = vector.shape_cast %55 : vector<1x12x48xbf16> to vector<12x48xbf16>
    %cst_36 = arith.constant dense<0.000000e+00> : vector<12x256xf32>
    %57 = tpu.matmul %56, %18, %cst_36 {dimension_numbers = #tpu.dot_dimension_numbers<[1], [0], [0], [1], [0, 0, 1, 1], [], []>} : vector<12x48xbf16>, vector<48x256xbf16>, vector<12x256xf32> -> vector<12x256xf32>
    %58 = vector.extract_strided_slice %57 {offsets = [0, 255], sizes = [12, 1], strides = [1, 1]} : vector<12x256xf32> to vector<12x1xf32>
    %59 = vector.extract_strided_slice %57 {offsets = [0, 0], sizes = [12, 255], strides = [1, 1]} : vector<12x256xf32> to vector<12x255xf32>
    %60 = tpu.concatenate %58, %59 in 1 : vector<12x1xf32>, vector<12x255xf32> -> vector<12x256xf32>
    %c3_37 = arith.constant 3 : index
    %c0_38 = arith.constant 0 : index
    %c0_39 = arith.constant 0 : index
    %61 = vector.load %arg7[%c3_37, %c0_38, %c0_39] : memref<9x1x256xf32, #tpu.memory_space<vmem>>, vector<1x1x256xf32>
    %62 = vector.shape_cast %61 : vector<1x1x256xf32> to vector<1x256xf32>
    %63 = vector.broadcast %62 : vector<1x256xf32> to vector<12x256xf32>
    %64 = arith.mulf %60, %63 : vector<12x256xf32>
    %65 = arith.addf %54, %64 : vector<12x256xf32>
    %c5 = arith.constant 5 : index
    %c0_40 = arith.constant 0 : index
    %c0_41 = arith.constant 0 : index
    %66 = vector.load %arg6[%c5, %c0_40, %c0_41] : memref<9x12x48xbf16, #tpu.memory_space<vmem>>, vector<1x12x48xbf16>
    %67 = vector.shape_cast %66 : vector<1x12x48xbf16> to vector<12x48xbf16>
    %cst_42 = arith.constant dense<0.000000e+00> : vector<12x256xf32>
    %68 = tpu.matmul %67, %18, %cst_42 {dimension_numbers = #tpu.dot_dimension_numbers<[1], [0], [0], [1], [0, 0, 1, 1], [], []>} : vector<12x48xbf16>, vector<48x256xbf16>, vector<12x256xf32> -> vector<12x256xf32>
    %69 = vector.extract_strided_slice %68 {offsets = [0, 1], sizes = [12, 255], strides = [1, 1]} : vector<12x256xf32> to vector<12x255xf32>
    %70 = vector.extract_strided_slice %68 {offsets = [0, 0], sizes = [12, 1], strides = [1, 1]} : vector<12x256xf32> to vector<12x1xf32>
    %71 = tpu.concatenate %69, %70 in 1 : vector<12x255xf32>, vector<12x1xf32> -> vector<12x256xf32>
    %c5_43 = arith.constant 5 : index
    %c0_44 = arith.constant 0 : index
    %c0_45 = arith.constant 0 : index
    %72 = vector.load %arg7[%c5_43, %c0_44, %c0_45] : memref<9x1x256xf32, #tpu.memory_space<vmem>>, vector<1x1x256xf32>
    %73 = vector.shape_cast %72 : vector<1x1x256xf32> to vector<1x256xf32>
    %74 = vector.broadcast %73 : vector<1x256xf32> to vector<12x256xf32>
    %75 = arith.mulf %71, %74 : vector<12x256xf32>
    %76 = arith.addf %65, %75 : vector<12x256xf32>
    %c6 = arith.constant 6 : index
    %c0_46 = arith.constant 0 : index
    %c0_47 = arith.constant 0 : index
    %77 = vector.load %arg6[%c6, %c0_46, %c0_47] : memref<9x12x48xbf16, #tpu.memory_space<vmem>>, vector<1x12x48xbf16>
    %78 = vector.shape_cast %77 : vector<1x12x48xbf16> to vector<12x48xbf16>
    %cst_48 = arith.constant dense<0.000000e+00> : vector<12x256xf32>
    %79 = tpu.matmul %78, %18, %cst_48 {dimension_numbers = #tpu.dot_dimension_numbers<[1], [0], [0], [1], [0, 0, 1, 1], [], []>} : vector<12x48xbf16>, vector<48x256xbf16>, vector<12x256xf32> -> vector<12x256xf32>
    %80 = vector.extract_strided_slice %79 {offsets = [0, 15], sizes = [12, 241], strides = [1, 1]} : vector<12x256xf32> to vector<12x241xf32>
    %81 = vector.extract_strided_slice %79 {offsets = [0, 0], sizes = [12, 15], strides = [1, 1]} : vector<12x256xf32> to vector<12x15xf32>
    %82 = tpu.concatenate %80, %81 in 1 : vector<12x241xf32>, vector<12x15xf32> -> vector<12x256xf32>
    %c6_49 = arith.constant 6 : index
    %c0_50 = arith.constant 0 : index
    %c0_51 = arith.constant 0 : index
    %83 = vector.load %arg7[%c6_49, %c0_50, %c0_51] : memref<9x1x256xf32, #tpu.memory_space<vmem>>, vector<1x1x256xf32>
    %84 = vector.shape_cast %83 : vector<1x1x256xf32> to vector<1x256xf32>
    %85 = vector.broadcast %84 : vector<1x256xf32> to vector<12x256xf32>
    %86 = arith.mulf %82, %85 : vector<12x256xf32>
    %87 = arith.addf %76, %86 : vector<12x256xf32>
    %c7 = arith.constant 7 : index
    %c0_52 = arith.constant 0 : index
    %c0_53 = arith.constant 0 : index
    %88 = vector.load %arg6[%c7, %c0_52, %c0_53] : memref<9x12x48xbf16, #tpu.memory_space<vmem>>, vector<1x12x48xbf16>
    %89 = vector.shape_cast %88 : vector<1x12x48xbf16> to vector<12x48xbf16>
    %cst_54 = arith.constant dense<0.000000e+00> : vector<12x256xf32>
    %90 = tpu.matmul %89, %18, %cst_54 {dimension_numbers = #tpu.dot_dimension_numbers<[1], [0], [0], [1], [0, 0, 1, 1], [], []>} : vector<12x48xbf16>, vector<48x256xbf16>, vector<12x256xf32> -> vector<12x256xf32>
    %91 = vector.extract_strided_slice %90 {offsets = [0, 16], sizes = [12, 240], strides = [1, 1]} : vector<12x256xf32> to vector<12x240xf32>
    %92 = vector.extract_strided_slice %90 {offsets = [0, 0], sizes = [12, 16], strides = [1, 1]} : vector<12x256xf32> to vector<12x16xf32>
    %93 = tpu.concatenate %91, %92 in 1 : vector<12x240xf32>, vector<12x16xf32> -> vector<12x256xf32>
    %c7_55 = arith.constant 7 : index
    %c0_56 = arith.constant 0 : index
    %c0_57 = arith.constant 0 : index
    %94 = vector.load %arg7[%c7_55, %c0_56, %c0_57] : memref<9x1x256xf32, #tpu.memory_space<vmem>>, vector<1x1x256xf32>
    %95 = vector.shape_cast %94 : vector<1x1x256xf32> to vector<1x256xf32>
    %96 = vector.broadcast %95 : vector<1x256xf32> to vector<12x256xf32>
    %97 = arith.mulf %93, %96 : vector<12x256xf32>
    %98 = arith.addf %87, %97 : vector<12x256xf32>
    %c8 = arith.constant 8 : index
    %c0_58 = arith.constant 0 : index
    %c0_59 = arith.constant 0 : index
    %99 = vector.load %arg6[%c8, %c0_58, %c0_59] : memref<9x12x48xbf16, #tpu.memory_space<vmem>>, vector<1x12x48xbf16>
    %100 = vector.shape_cast %99 : vector<1x12x48xbf16> to vector<12x48xbf16>
    %cst_60 = arith.constant dense<0.000000e+00> : vector<12x256xf32>
    %101 = tpu.matmul %100, %18, %cst_60 {dimension_numbers = #tpu.dot_dimension_numbers<[1], [0], [0], [1], [0, 0, 1, 1], [], []>} : vector<12x48xbf16>, vector<48x256xbf16>, vector<12x256xf32> -> vector<12x256xf32>
    %102 = vector.extract_strided_slice %101 {offsets = [0, 17], sizes = [12, 239], strides = [1, 1]} : vector<12x256xf32> to vector<12x239xf32>
    %103 = vector.extract_strided_slice %101 {offsets = [0, 0], sizes = [12, 17], strides = [1, 1]} : vector<12x256xf32> to vector<12x17xf32>
    %104 = tpu.concatenate %102, %103 in 1 : vector<12x239xf32>, vector<12x17xf32> -> vector<12x256xf32>
    %c8_61 = arith.constant 8 : index
    %c0_62 = arith.constant 0 : index
    %c0_63 = arith.constant 0 : index
    %105 = vector.load %arg7[%c8_61, %c0_62, %c0_63] : memref<9x1x256xf32, #tpu.memory_space<vmem>>, vector<1x1x256xf32>
    %106 = vector.shape_cast %105 : vector<1x1x256xf32> to vector<1x256xf32>
    %107 = vector.broadcast %106 : vector<1x256xf32> to vector<12x256xf32>
    %108 = arith.mulf %104, %107 : vector<12x256xf32>
    %109 = arith.addf %98, %108 : vector<12x256xf32>
    %c0_64 = arith.constant 0 : index
    %c0_65 = arith.constant 0 : index
    %c0_66 = arith.constant 0 : index
    %110 = vector.load %arg8[%c0_64, %c0_65, %c0_66] : memref<1x28x256xf32, #tpu.memory_space<vmem>>, vector<1x12x256xf32>
    %111 = vector.shape_cast %110 : vector<1x12x256xf32> to vector<12x256xf32>
    %112 = vector.shape_cast %109 : vector<12x256xf32> to vector<1x12x256xf32>
    tpu.vector_store %arg8[%c0_64, %c0_65, %c0_66], %112 {strides = array<i32>} : memref<1x28x256xf32, #tpu.memory_space<vmem>>, vector<1x12x256xf32>,
    %c0_67 = arith.constant 0 : index
    %c12 = arith.constant 12 : index
    %c0_68 = arith.constant 0 : index
    %113 = vector.load %arg8[%c0_67, %c12, %c0_68] : memref<1x28x256xf32, #tpu.memory_space<vmem>>, vector<1x16x256xf32>
    %114 = vector.shape_cast %113 : vector<1x16x256xf32> to vector<16x256xf32>
    %115 = vector.shape_cast %1 : vector<16x256xf32> to vector<1x16x256xf32>
    tpu.vector_store %arg8[%c0_67, %c12, %c0_68], %115 {strides = array<i32>} : memref<1x28x256xf32, #tpu.memory_space<vmem>>, vector<1x16x256xf32>,
    return
  }
  func.func @transform_0(%arg0: i32) -> (i32, i32, i32) {
    %c0_i32 = arith.constant 0 : i32
    %c0_i32_0 = arith.constant 0 : i32
    %c0_i32_1 = arith.constant 0 : i32
    return %arg0, %c0_i32, %c0_i32_0 : i32, i32, i32
  }
  func.func @transform_1(%arg0: i32) -> (i32, i32) {
    %c0_i32 = arith.constant 0 : i32
    %c0_i32_0 = arith.constant 0 : i32
    %c0_i32_1 = arith.constant 0 : i32
    return %c0_i32, %c0_i32_0 : i32, i32
  }
  func.func @transform_2(%arg0: i32) -> (i32, i32) {
    %c0_i32 = arith.constant 0 : i32
    %c0_i32_0 = arith.constant 0 : i32
    %c0_i32_1 = arith.constant 0 : i32
    return %c0_i32, %c0_i32_0 : i32, i32
  }
  func.func @transform_3(%arg0: i32) -> (i32, i32) {
    %c0_i32 = arith.constant 0 : i32
    %c0_i32_0 = arith.constant 0 : i32
    %c0_i32_1 = arith.constant 0 : i32
    return %c0_i32, %c0_i32_0 : i32, i32
  }
  func.func @transform_4(%arg0: i32) -> (i32, i32) {
    %c0_i32 = arith.constant 0 : i32
    %c0_i32_0 = arith.constant 0 : i32
    %c0_i32_1 = arith.constant 0 : i32
    return %c0_i32, %c0_i32_0 : i32, i32
  }
  func.func @transform_5(%arg0: i32) -> (i32, i32, i32) {
    %c0_i32 = arith.constant 0 : i32
    %c0_i32_0 = arith.constant 0 : i32
    %c0_i32_1 = arith.constant 0 : i32
    %c0_i32_2 = arith.constant 0 : i32
    return %c0_i32, %c0_i32_0, %c0_i32_1 : i32, i32, i32
  }
  func.func @transform_6(%arg0: i32) -> (i32, i32, i32) {
    %c0_i32 = arith.constant 0 : i32
    %c0_i32_0 = arith.constant 0 : i32
    %c0_i32_1 = arith.constant 0 : i32
    %c0_i32_2 = arith.constant 0 : i32
    return %c0_i32, %c0_i32_0, %c0_i32_1 : i32, i32, i32
  }
  func.func @transform_7(%arg0: i32) -> (i32, i32, i32) {
    %c0_i32 = arith.constant 0 : i32
    %c0_i32_0 = arith.constant 0 : i32
    %c0_i32_1 = arith.constant 0 : i32
    return %arg0, %c0_i32, %c0_i32_0 : i32, i32, i32
  }
}

</mosaic_0001>

<bundles_post_ra>
// kernel: tpu_custom_call.1
= control target key start
LH: loop header
LB: loop body
LE: loop exit
PB: predicated region body
PF: predicated region fallthrough
CT: control target
= control target key end

     0   :  { %12 = vsyncpa [#allocation3], 0  ;;  %s1944_s0 = inlined_call_operand.hbm [shape: f32[2,16,256], index: 0, kind: input, shape index: {}]   ;;  %s1945_s1 = inlined_call_operand.vmem [shape: f32[16,1], index: 1, kind: input, shape index: {}]   ;;  %s1946_s2 = inlined_call_operand.vmem [shape: f32[16,1], index: 2, kind: input, shape index: {}]   ;;  %s1947_s3 = inlined_call_operand.vmem [shape: bf16[48,16], index: 3, kind: input, shape index: {}]   ;;  %s1948_s4 = inlined_call_operand.vmem [shape: f32[48,1], index: 4, kind: input, shape index: {}]   ;;  %s1949_s5 = inlined_call_operand.vmem [shape: bf16[9,12,48], index: 5, kind: input, shape index: {}]   ;;  %s1950_s6 = inlined_call_operand.vmem [shape: f32[9,1,256], index: 6, kind: input, shape index: {}]   ;;  %s1951_s7 = inlined_call_operand.vmem [shape: f32[2,28,256], index: 7, kind: output, shape index: {}]  }
   0x1   :  { %14 = vsyncpa [#allocation3 + $0x1], 0  ;;  %s1511_s24 = smov 0   ;;  %s1513_s25 = smov 0  }
   0x2   :  { %s1515_s26 = smov 0   ;;  %s1517_s27 = smov 0  }
   0x3 LB: > { %s1530_s28 = sadd.s32 4294967295, %s1458_s27   ;;  %s1533_s29 = sadd.s32 1, %s1458_s27   ;;  %s1458_s27 = sphi %s1517_s27, %s1958_s27   ;;  %s1454_s26 = sphi %s1515_s26, %s1957_s26   ;;  %s1450_s25 = sphi %s1513_s25, %s1956_s25   ;;  %s1446_s24 = sphi %s1511_s24, %s1955_s24  }
   0x4   : > { %s24_s30 = ssub.s32 %s1458_s27, %s1533_s29  ;;  %s27_s8 = sadd.s32 1, %s1454_s26 }
   0x5   : > { %p25_p0 = scmp.eq.s32.totalorder %s24_s30, 0  ;;  %p34_p1 = scmp.ne.s32.totalorder %s1454_s26, %s1450_s25 }
   0x6   : > { %p35_p2 = scmp.eq.s32.totalorder %s1458_s27, 0  ;;  %p40_p3 = scmp.ne.s32.totalorder %s1450_s25, %s1446_s24 }
   0x7   : > { %s1543_s9 = scalar_select %p25_p0, %s1454_s26, %s27_s8  }
   0x8   : > { %p1545_p4 = por %p35_p2, %p34_p1  ;;  %p41_p5 = scmp.eq.s32.totalorder %s1530_s28, 0 }
   0x9   : > { %p1347_p6 = scmp.lt.s32.totalorder %s1458_s27, 2  ;;  %s234_s12 = sand.u32 1, %s1454_s26  }
   0xa   : > { %p1551_p7 = por %p41_p5, %p40_p3  ;;  %s1223_s13 = sshll.u32 %s234_s12, 5 }
   0xb   : > { %s1327_s14 = sshll.u32 %s1458_s27, 5  ;;  %s238_s18 = scalar_lea.vmem [#allocation2], %s1223_s13 }
   0xc   : > { %s243_s17 = scalar_lea.hbm %s1944_s0, %s1327_s14  ;;  %s246_s19 = sshll.u32 %s238_s18, 4  ;;  %s247_s19 = int_to_ptr.vmem [resolvable:$true] %s246_s19 }
   0xd   : > { %s244_s20 = sshll.u32 %s243_s17, 4  ;;  %p1562_p8 = pnand %p1347_p6, %p1545_p4  ;;  %s245_s20 = int_to_ptr.hbm [resolvable:$true] %s244_s20 }
   0xe   : > { %p1226_p9 = scmp.ge.s32.totalorder %s1458_s27, 1  ;;  %s235_s22 = scalar_lea.sflag [#allocation3], %s234_s12 }
   0xf   : > { %s1394_s23 = sshra.s32 %s245_s20, 4  ;;  %p1398_p11 = pneg %p1562_p8  ;;  %s1395_s23 = int_to_ptr.hbm [resolvable:$true] %s1394_s23 }
  0x10   : > { %s1396_s24 = scalar_lea.hbm %s1395_s23, 32  ;;  %s1401_s13 = scalar_lea.hbm %s1944_s0, 64 }
  0x11   : > { %p1397_p10 = scmp.ne.s32.totalorder %s1395_s23, %s1396_s24  ;;  %p1402_p0 = scmp.lt.s32.totalorder %s1395_s23, %s1944_s0 }
  0x12   : > { %p1403_p1 = scmp.lt.s32.totalorder %s1401_s13, %s1396_s24 }
  0x13   : > { %p1399_p12 = pnand %p1398_p11, %p1397_p10 }
  0x14   : > { %p1404_p2 = por %p1403_p1, %p1402_p0 }
  0x15   : > { %p1400_p13 = pneg %p1399_p12 }
  0x17   : > { %p1405_p3 = pnand %p1404_p2, %p1400_p13 }
  0x19   : > { %1408 = shalt.err (!%p1405_p3)
}
  0x1a   : > { %s1460_s12 = smov 256   ;;  %s1461_s15 = smov 16  }
  0x1b   : > { %1346 = dma.hbm_to_vmem [thread:$0]  (!%p1562_p8), %s245_s20, 512, %s247_s19, %s235_s22, %s1460_s12, %s1460_s12, %s1461_s15  }
  0x1c   : > { %p254_p4 = scmp.lt.s32.totalorder %s1458_s27, 3 }
  0x1e   : > { %p255_p5 = pnand %p1226_p9, %p254_p4 }
  0x1f   : > { %s260_s16 = sand.u32 (!%p255_p5), 1, %s1450_s25  }
  0x20   : > { %258 = sbr.rel (%p255_p5) target bundleno = 700 (0x2bc), region = 48  ;;  %s1227_s17 = sshll.u32 (!%p255_p5), %s260_s16, 5 }
  0x21   : > { %s261_s18 = scalar_lea.sflag (!%p255_p5), [#allocation3], %s260_s16  ;;  %s1581_s23 = scalar_lea.vmem (!%p255_p5), [#allocation2], %s1227_s17 }
  0x25   : > { %1441 = dma.done.wait (%p1551_p7), %s261_s18, 512  }
  0x26   : > { %1443 = vsyncadd (%p1551_p7), %s261_s18, 4294966784  ;;  %v1462_v0 = vmov 0   ;;  %v322_v1 = vld [vmem:[%s1946_s2] sm:$0xff]  ;;  %v323_v3 = vld [vmem:[%s1946_s2 + $0x8] sm:$0xff]  ;;  %p296_p6 = scmp.lt.s32.totalorder %s1530_s28, 1  ;;  %vm1134_vm0 = vcmask 1043456  }
  0x27   : > { %1392 = vset.pattern.permute.xlu1 %v1462_v0  ;;  %1391 = vset.pattern.permute.xlu0 %v1462_v0  ;;  %v306_v2 = vld [vmem:[%s1945_s1] sm:$0xff]  ;;  %v307_v4 = vld [vmem:[%s1945_s1 + $0x8] sm:$0xff]  ;;  %v353_v5 = vld [vmem:[%s1948_s4 + $0x18] sm:$0xff]  ;;  %vm401_vm1 = vcmask 130048   ;;  %vm487_vm2 = vcmask 392192   ;;  %s1463_s14 = smov 15  }
  0x28   : > { %1393 = vset.pattern.permute.xlu2 %v1462_v0  ;;  %326 = vperm.xlu1 %1392, %v322_v1   ;;  %v352_v6 = vld [vmem:[%s1948_s4 + $0x10] sm:$0xff]  ;;  %v351_v7 = vld [vmem:[%s1948_s4 + $0x8] sm:$0xff]  ;;  %s1960_s28 = smov (!%p296_p6, %s1530_s28), 1  ;;  %v302_v8 = vld [vmem:[%s1581_s23] sm:$0xff]  ;;  %s1464_s12 = smov 17   ;;  %vm533_vm3 = vcmask 138240  }
  0x29   : > { %310 = vperm.xlu0 %1391, %v306_v2   ;;  %s1328_s16 = sshll.u32 %s1960_s28, 6  ;;  %v303_v9 = vld [vmem:[%s1581_s23 + $0x8] sm:$0xff]  ;;  %v1135_v10 = vrot.slane %v302_v8, 4  ;;  %v304_v12 = vld [vmem:[%s1581_s23 + $0x10] sm:$0xff]  ;;  %v305_v13 = vld [vmem:[%s1581_s23 + $0x18] sm:$0xff]  ;;  %s1465_s15 = smov 127  }
  0x2a   : > { %v1136_v11 = vrot.slane %v303_v9, 4  ;;  %s1615_s27 = scalar_lea.vmem %s1951_s7, %s1328_s16  ;;  %v1137_v14 = vrot.slane %v304_v12, 4  ;;  %v1139_v15 = vrot.slane %v305_v13, 4  ;;  %v354_v20 = vld [vmem:[%s1948_s4 + $0x20] sm:$0xff]  ;;  %v355_v29 = vld [vmem:[%s1948_s4 + $0x28] sm:$0xff]  ;;  %v1331_v41 = vld [vmem:[%s1947_s3 + $0x10] sm:$0xff] }
  0x2b   : > { %1147 = vst [vmem:[%s1615_s27 + $0x10] sm:$0xf0] %v1135_v10  ;;  %378 = vperm.xlu2 %1393, %v354_v20   ;;  %v1329_v38 = vld [vmem:[%s1947_s3] sm:$0xff]  ;;  %v1330_v40 = vld [vmem:[%s1947_s3 + $0x8] sm:$0xff]  ;;  %s1466_s16 = smov 112   ;;  %s1467_s17 = smov 16  }
  0x2c   : > { %1148 = vst [vmem:[%s1615_s27 + $0x18] sm:$0xf0] %v1136_v11  ;;  %v1138_v16 = vsel %vm1134_vm0, %v1135_v10, %v1137_v14  ;;  %v1140_v17 = vsel %vm1134_vm0, %v1136_v11, %v1139_v15  ;;  %v350_v39 = vld [vmem:[%s1948_s4] sm:$0xff]  ;;  %s1468_s18 = smov 1   ;;  %s1469_s28 = smov 113   ;;  %vm717_vm4 = vcmask 121856  }
  0x2d   : > { %1151 = vst [vmem:[%s1615_s27 + $0x30] sm:$0xf] %v1137_v14  ;;  %s1470_s19 = smov 111   ;;  %vm869_vm5 = vcmask 1039360   ;;  %vm794_vm6 = vcmask 7168   ;;  %vm1023_vm7 = vcmask 916480  }
  0x2e   : > { %1149 = vst [vmem:[%s1615_s27 + $0x20] sm:$0xff] %v1138_v16  ;;  %vm946_vm8 = vcmask 924672   ;;  %vm1100_vm9 = vcmask 908288  }
  0x2f   : > { %1150 = vst [vmem:[%s1615_s27 + $0x28] sm:$0xff] %v1140_v17 }
  0x30   : > { %331 = vperm.xlu1 %1392, %v323_v3   ;;  %1152 = vst [vmem:[%s1615_s27 + $0x38] sm:$0xf] %v1139_v15 }
  0x31   : > { %315 = vperm.xlu0 %1391, %v307_v4  }
  0x33   : > { %383 = vperm.xlu2 %1393, %v355_v29   ;;  %v1335_v29 = vld [vmem:[%s1949_s5 + $0x10] sm:$0x30] }
  0x38   : > { %373 = vperm.xlu1 %1392, %v353_v5  }
  0x39   : > { %368 = vperm.xlu0 %1391, %v352_v6  }
  0x3b   : > { %358 = vperm.xlu2 %1393, %v350_v39   ;;  %v1334_v39 = vld [vmem:[%s1949_s5 + $0x8] sm:$0x30] }
  0x41   : > { %363 = vperm.xlu0 %1391, %v351_v7  }
  0x85   : > { %v379_v48 = vpop.permute.xlu2 %378 }
  0x8d   : > { %v384_v54 = vpop.permute.xlu2 %383 }
  0x95   : > { %v359_v3 = vpop.permute.xlu2 %358 }
  0x9a   : > { %v327_v18 = vpop.permute.xlu1 %326 }
  0x9b   : > { %v311_v19 = vpop.permute.xlu0 %310 }
  0x9c   : > { %v318_v21 = vmul.f32 %v311_v19, %v302_v8  ;;  %v319_v22 = vmul.f32 %v311_v19, %v303_v9 }
  0x9e   : > { %v334_v26 = vadd.f32 %v327_v18, %v318_v21  ;;  %v335_v27 = vadd.f32 %v327_v18, %v319_v22 }
  0xa0   : > { %v338_v32 = vmax.f32 %v334_v26, 0.0  ;;  %v339_v34 = vmax.f32 %v335_v27, 0.0 }
  0xa2   : > { %v332_v28 = vpop.permute.xlu1 %331 }
  0xa3   : > { %v316_v23 = vpop.permute.xlu0 %315 }
  0xa4   : > { %v320_v24 = vmul.f32 %v316_v23, %v304_v12  ;;  %v321_v25 = vmul.f32 %v316_v23, %v305_v13 }
  0xa6   : > { %v336_v30 = vadd.f32 %v332_v28, %v320_v24  ;;  %v337_v31 = vadd.f32 %v332_v28, %v321_v25  ;;  %v1252_v24 = vld [vmem:[%s1949_s5] sm:$0xf]  ;;  %v1333_v25 = vld [vmem:[%s1949_s5] sm:$0x30]  ;;  %v1275_v28 = vld [vmem:[%s1949_s5 + $0x10] sm:$0xf] }
  0xa8   : > { %v340_v33 = vmax.f32 %v336_v30, 0.0  ;;  %v341_v35 = vmax.f32 %v337_v31, 0.0  ;;  %v1253_v30 = vor.u32 %v1333_v25, %v1252_v24  ;;  %v1276_v31 = vor.u32 %v1335_v29, %v1275_v28 }
  0xaa   : > { %v348_v36 = vpack.c.bf16 %v340_v33, %v338_v32  ;;  %v349_v37 = vpack.c.bf16 %v341_v35, %v339_v34  ;;  %v374_v55 = vpop.permute.xlu1 %373  ;;  %v1258_v32 = vld [vmem:[%s1949_s5 + $0x20] sm:$0xf]  ;;  %v1332_v33 = vld [vmem:[%s1949_s5 + $0x20] sm:$0x30]  ;;  %v1293_v34 = vld [vmem:[%s1949_s5 + $0x28] sm:$0xf] }
  0xab   : > { %v369_v53 = vpop.permute.xlu0 %368  ;;  %v1337_v35 = vld [vmem:[%s1949_s5 + $0x28] sm:$0x30] }
  0xac   : > { %418 = vmatpush.bf16.msra.mxu0 %v348_v36  ;;  %442 = vmatpush.bf16.msra.mxu1 %v349_v37  ;;  %v1259_v36 = vor.u32 %v1332_v33, %v1258_v32  ;;  %v1294_v37 = vor.u32 %v1337_v35, %v1293_v34 }
  0xaf   : > { %1242 = vmatmul.msk.bf16.vlgmr.msra.gmra.mxu0 %vm401_vm1, %v1329_v38  ;;  %1245 = vmatmul.msk.bf16.vlgmr.msra.gmra.mxu1 %vm401_vm1, %v1329_v38  ;;  %v1266_v38 = vld [vmem:[%s1949_s5 + $0x8] sm:$0xf] }
  0xb3   : > { %v364_v2 = vpop.permute.xlu0 %363 }
  0xbf   : > { %1243 = vmatmul.msk.bf16.gmra.mxu0 %vm401_vm1, %v1330_v40  ;;  %1246 = vmatmul.msk.bf16.gmra.mxu1 %vm401_vm1, %v1330_v40  ;;  %v1311_v40 = vld [vmem:[%s1949_s5 + $0x38] sm:$0xf] }
  0xcf   : > { %1244 = vmatmul.msk.bf16.gmra.mxu0 %vm401_vm1, %v1331_v41  ;;  %1247 = vmatmul.msk.bf16.gmra.mxu1 %vm401_vm1, %v1331_v41  ;;  %v1339_v41 = vld [vmem:[%s1949_s5 + $0x38] sm:$0x30] }
 0x12c   : > { %v420_v42 = vpop.f32.mrf.mxu0  ;;  %v444_v43 = vpop.f32.mrf.mxu1 }
 0x12d   : > { %v445_v8 = vadd.f32 %v444_v43, %v359_v3  ;;  %v421_v15 = vadd.f32 %v420_v42, %v359_v3  ;;  %v1267_v42 = vor.u32 %v1334_v39, %v1266_v38  ;;  %v1312_v43 = vor.u32 %v1339_v41, %v1311_v40 }
 0x12f   : > { %v460_v18 = vmax.f32 %v445_v8, 0.0  ;;  %v459_v23 = vmax.f32 %v421_v15, 0.0 }
 0x134   : > { %v422_v44 = vpop.f32.mrf.mxu0  ;;  %v446_v45 = vpop.f32.mrf.mxu1 }
 0x135   : > { %v423_v9 = vadd.f32 %v422_v44, %v364_v2  ;;  %v447_v10 = vadd.f32 %v446_v45, %v364_v2  ;;  %v1284_v44 = vld [vmem:[%s1949_s5 + $0x18] sm:$0xf]  ;;  %v1336_v45 = vld [vmem:[%s1949_s5 + $0x18] sm:$0x30] }
 0x137   : > { %v461_v19 = vmax.f32 %v423_v9, 0.0  ;;  %v462_v20 = vmax.f32 %v447_v10, 0.0 }
 0x139   : > { %v1671_v26 = vpack.c.bf16 %v461_v19, %v459_v23  ;;  %v1673_v27 = vpack.c.bf16 %v462_v20, %v460_v18 }
 0x13c   : > { %v425_v46 = vpop.f32.mrf.mxu0  ;;  %v449_v47 = vpop.f32.mrf.mxu1 }
 0x13d   : > { %v426_v0 = vadd.f32 %v425_v46, %v369_v53  ;;  %v450_v1 = vadd.f32 %v449_v47, %v369_v53  ;;  %v1285_v46 = vor.u32 %v1336_v45, %v1284_v44  ;;  %v1302_v47 = vld [vmem:[%s1949_s5 + $0x30] sm:$0xf]  ;;  %v542_v45 = vld [vmem:[%s1950_s6] sm:$0x3] }
 0x13f   : > { %v463_v16 = vmax.f32 %v426_v0, 0.0  ;;  %v464_v17 = vmax.f32 %v450_v1, 0.0 }
 0x144   : > { %v427_v49 = vpop.f32.mrf.mxu0  ;;  %v451_v50 = vpop.f32.mrf.mxu1 }
 0x145   : > { %v428_v60 = vadd.f32 %v427_v49, %v374_v55  ;;  %v452_v61 = vadd.f32 %v451_v50, %v374_v55  ;;  %v1320_v50 = vld [vmem:[%s1949_s5 + $0x40] sm:$0xf] }
 0x147   : > { %v465_v11 = vmax.f32 %v428_v60, 0.0  ;;  %v466_v12 = vmax.f32 %v452_v61, 0.0 }
 0x149   : > { %v1657_v21 = vpack.c.bf16 %v465_v11, %v463_v16  ;;  %v1659_v22 = vpack.c.bf16 %v466_v12, %v464_v17 }
 0x14c   : > { %v430_v51 = vpop.f32.mrf.mxu0  ;;  %v454_v52 = vpop.f32.mrf.mxu1 }
 0x14d   : > { %v431_v56 = vadd.f32 %v430_v51, %v379_v48  ;;  %v455_v57 = vadd.f32 %v454_v52, %v379_v48  ;;  %v1338_v48 = vld [vmem:[%s1949_s5 + $0x30] sm:$0x30]  ;;  %v1340_v51 = vld [vmem:[%s1949_s5 + $0x40] sm:$0x30] }
 0x14e   : > { %v1303_v49 = vor.u32 %v1338_v48, %v1302_v47  ;;  %v1321_v52 = vor.u32 %v1340_v51, %v1320_v50  ;;  %v544_v47 = vperm.slane %v542_v45, 0  ;;  %v1270_v48 = vld [vmem:[%s1950_s6 + $0x2] sm:$0x3] }
 0x14f   : > { %v467_v4 = vmax.f32 %v431_v56, 0.0  ;;  %v468_v5 = vmax.f32 %v455_v57, 0.0 }
 0x154   : > { %v432_v58 = vpop.f32.mrf.mxu0  ;;  %v456_v59 = vpop.f32.mrf.mxu1 }
 0x155   : > { %v433_v62 = vadd.f32 %v432_v58, %v384_v54  ;;  %v457_v63 = vadd.f32 %v456_v59, %v384_v54 }
 0x157   : > { %v469_v6 = vmax.f32 %v433_v62, 0.0  ;;  %v470_v7 = vmax.f32 %v457_v63, 0.0 }
 0x159   : > { %v1649_v13 = vpack.c.bf16 %v469_v6, %v467_v4  ;;  %v1651_v14 = vpack.c.bf16 %v470_v7, %v468_v5 }
 0x15b   : > { %496 = vmatpush.bf16.msra.mxu2 %v1649_v13  ;;  %510 = vmatpush.bf16.msra.mxu3 %v1651_v14 }
 0x15c   : > { %680 = vmatpush.bf16.msrb.mxu0 %v1649_v13  ;;  %694 = vmatpush.bf16.msrb.mxu1 %v1651_v14 }
 0x15f   : > { %497 = vmatpush.bf16.msra.mxu2 %v1657_v21  ;;  %511 = vmatpush.bf16.msra.mxu3 %v1659_v22 }
 0x160   : > { %681 = vmatpush.bf16.msrb.mxu0 %v1657_v21  ;;  %695 = vmatpush.bf16.msrb.mxu1 %v1659_v22 }
 0x163   : > { %498 = vmatpush.bf16.msra.mxu2 %v1671_v26  ;;  %512 = vmatpush.bf16.msra.mxu3 %v1673_v27 }
 0x164   : > { %682 = vmatpush.bf16.msrb.mxu0 %v1671_v26  ;;  %696 = vmatpush.bf16.msrb.mxu1 %v1673_v27 }
 0x166   : > { %1254 = vmatmul.msk.bf16.vlgmr.msra.gmra.mxu2 %vm487_vm2, %v1253_v30  ;;  %1255 = vmatmul.msk.bf16.vlgmr.msra.gmra.mxu3 %vm487_vm2, %v1253_v30 }
 0x167   : > { %565 = vmatpush.bf16.msrb.mxu2 %v1649_v13  ;;  %579 = vmatpush.bf16.msrb.mxu3 %v1651_v14 }
 0x168   : > { %834 = vmatpush.bf16.msra.mxu0 %v1649_v13  ;;  %848 = vmatpush.bf16.msra.mxu1 %v1651_v14 }
 0x169   : > { %1277 = vmatmul.msk.bf16.vlgmr.msrb.gmra.mxu0 %vm487_vm2, %v1276_v31  ;;  %1278 = vmatmul.msk.bf16.vlgmr.msrb.gmra.mxu1 %vm487_vm2, %v1276_v31 }
 0x16b   : > { %566 = vmatpush.bf16.msrb.mxu2 %v1657_v21  ;;  %580 = vmatpush.bf16.msrb.mxu3 %v1659_v22 }
 0x16c   : > { %835 = vmatpush.bf16.msra.mxu0 %v1657_v21  ;;  %849 = vmatpush.bf16.msra.mxu1 %v1659_v22 }
 0x16f   : > { %567 = vmatpush.bf16.msrb.mxu2 %v1671_v26  ;;  %581 = vmatpush.bf16.msrb.mxu3 %v1673_v27 }
 0x170   : > { %836 = vmatpush.bf16.msra.mxu0 %v1671_v26  ;;  %850 = vmatpush.bf16.msra.mxu1 %v1673_v27 }
 0x173   : > { %604 = vmatpush.bf16.msra.mxu2 %v1649_v13  ;;  %618 = vmatpush.bf16.msra.mxu3 %v1651_v14 }
 0x174   : > { %988 = vmatpush.bf16.msrb.mxu0 %v1649_v13  ;;  %1002 = vmatpush.bf16.msrb.mxu1 %v1651_v14 }
 0x176   : > { %1260 = vmatmul.msk.bf16.vlgmr.msrb.gmra.mxu2 %vm487_vm2, %v1259_v36  ;;  %1261 = vmatmul.msk.bf16.vlgmr.msrb.gmra.mxu3 %vm487_vm2, %v1259_v36 }
 0x177   : > { %605 = vmatpush.bf16.msra.mxu2 %v1657_v21  ;;  %619 = vmatpush.bf16.msra.mxu3 %v1659_v22 }
 0x178   : > { %989 = vmatpush.bf16.msrb.mxu0 %v1657_v21  ;;  %1003 = vmatpush.bf16.msrb.mxu1 %v1659_v22 }
 0x179   : > { %1295 = vmatmul.msk.bf16.vlgmr.msra.gmra.mxu0 %vm487_vm2, %v1294_v37  ;;  %1296 = vmatmul.msk.bf16.vlgmr.msra.gmra.mxu1 %vm487_vm2, %v1294_v37 }
 0x17b   : > { %606 = vmatpush.bf16.msra.mxu2 %v1671_v26  ;;  %620 = vmatpush.bf16.msra.mxu3 %v1673_v27 }
 0x17c   : > { %990 = vmatpush.bf16.msrb.mxu0 %v1671_v26  ;;  %1004 = vmatpush.bf16.msrb.mxu1 %v1673_v27 }
 0x17f   : > { %757 = vmatpush.bf16.msrb.mxu2 %v1649_v13  ;;  %771 = vmatpush.bf16.msrb.mxu3 %v1651_v14 }
 0x183   : > { %758 = vmatpush.bf16.msrb.mxu2 %v1657_v21  ;;  %772 = vmatpush.bf16.msrb.mxu3 %v1659_v22 }
 0x186   : > { %1268 = vmatmul.msk.bf16.vlgmr.msra.gmra.mxu2 %vm487_vm2, %v1267_v42  ;;  %1269 = vmatmul.msk.bf16.vlgmr.msra.gmra.mxu3 %vm487_vm2, %v1267_v42 }
 0x187   : > { %759 = vmatpush.bf16.msrb.mxu2 %v1671_v26  ;;  %773 = vmatpush.bf16.msrb.mxu3 %v1673_v27 }
 0x189   : > { %1313 = vmatmul.msk.bf16.vlgmr.msrb.gmra.mxu0 %vm487_vm2, %v1312_v43  ;;  %1314 = vmatmul.msk.bf16.vlgmr.msrb.gmra.mxu1 %vm487_vm2, %v1312_v43 }
 0x18b   : > { %911 = vmatpush.bf16.msra.mxu2 %v1649_v13  ;;  %925 = vmatpush.bf16.msra.mxu3 %v1651_v14 }
 0x18f   : > { %912 = vmatpush.bf16.msra.mxu2 %v1657_v21  ;;  %926 = vmatpush.bf16.msra.mxu3 %v1659_v22 }
 0x193   : > { %913 = vmatpush.bf16.msra.mxu2 %v1671_v26  ;;  %927 = vmatpush.bf16.msra.mxu3 %v1673_v27 }
 0x196   : > { %1286 = vmatmul.msk.bf16.vlgmr.msrb.gmra.mxu2 %vm487_vm2, %v1285_v46  ;;  %1287 = vmatmul.msk.bf16.vlgmr.msrb.gmra.mxu3 %vm487_vm2, %v1285_v46 }
 0x197   : > { %1065 = vmatpush.bf16.msrb.mxu2 %v1649_v13  ;;  %1079 = vmatpush.bf16.msrb.mxu3 %v1651_v14 }
 0x19b   : > { %1066 = vmatpush.bf16.msrb.mxu2 %v1657_v21  ;;  %1080 = vmatpush.bf16.msrb.mxu3 %v1659_v22 }
 0x19f   : > { %1067 = vmatpush.bf16.msrb.mxu2 %v1671_v26  ;;  %1081 = vmatpush.bf16.msrb.mxu3 %v1673_v27 }
 0x1a6   : > { %1304 = vmatmul.msk.bf16.vlgmr.msra.gmra.mxu2 %vm487_vm2, %v1303_v49  ;;  %1305 = vmatmul.msk.bf16.vlgmr.msra.gmra.mxu3 %vm487_vm2, %v1303_v49  ;;  %v545_v49 = vperm.slane %v542_v45, 1 }
 0x1b6   : > { %1322 = vmatmul.msk.bf16.vlgmr.msrb.gmra.mxu2 %vm487_vm2, %v1321_v52  ;;  %1323 = vmatmul.msk.bf16.vlgmr.msrb.gmra.mxu3 %vm487_vm2, %v1321_v52  ;;  %v1825_v52 = vld [vmem:[%s1950_s6 + $0x4] sm:$0x3] }
 0x1e6   : > { %v684_v53 = vpop.f32.mrf.mxu0  ;;  %v698_v54 = vpop.f32.mrf.mxu1 }
 0x1e7   : > { %705 = vrot.lane.b32.xlu0 %v698_v54, %s1463_s14  ;;  %713 = vrot.lane.b32.xlu2 %v684_v53, %s1463_s14  ;;  %v1831_v54 = vld [vmem:[%s1950_s6 + $0xa] sm:$0x3] }
 0x1e9   : > { %v500_v55 = vpop.f32.mrf.mxu2  ;;  %v514_v56 = vpop.f32.mrf.mxu3 }
 0x1ea   : > { %521 = vrot.lane.b32.xlu1 %v514_v56, %s1464_s12  ;;  %v652_v56 = vperm.slane %v1270_v48, 0 }
 0x1ee   : > { %v686_v57 = vpop.f32.mrf.mxu0  ;;  %v700_v58 = vpop.f32.mrf.mxu1 }
 0x1ef   : > { %529 = vrot.lane.b32.xlu0 %v500_v55, %s1464_s12  ;;  %v1836_v55 = vld [vmem:[%s1950_s6 + $0xe] sm:$0x3] }
 0x1f1   : > { %v516_v59 = vpop.f32.mrf.mxu3  ;;  %v502_v60 = vpop.f32.mrf.mxu2 }
 0x1f2   : > { %707 = vrot.lane.b32.xlu1 %v700_v58, %s1463_s14  ;;  %523 = vrot.lane.b32.xlu2 %v516_v59, %s1464_s12 }
 0x1f6   : > { %v838_v61 = vpop.f32.mrf.mxu0  ;;  %v852_v62 = vpop.f32.mrf.mxu1 }
 0x1f7   : > { %715 = vrot.lane.b32.xlu0 %v686_v57, %s1463_s14  ;;  %v653_v57 = vperm.slane %v1270_v48, 1 }
 0x1f9   : > { %v1787_v63 = vpop.f32.mrf.mxu3  ;;  %v1789_v0 = vpop.f32.mrf.mxu2 }
 0x1fa   : > { %531 = vrot.lane.b32.xlu1 %v502_v60, %s1464_s12  ;;  %861 = vrot.lane.b32.xlu2 %v838_v61, %s1465_s15  ;;  %v729_v61 = vperm.slane %v1825_v52, 0 }
 0x1fe   : > { %v840_v1 = vpop.f32.mrf.mxu0  ;;  %v854_v2 = vpop.f32.mrf.mxu1 }
 0x1ff   : > { %863 = vrot.lane.b32.xlu0 %v852_v62, %s1465_s15  ;;  %v730_v62 = vperm.slane %v1825_v52, 1 }
 0x201   : > { %v1791_v3 = vpop.f32.mrf.mxu3  ;;  %v1793_v4 = vpop.f32.mrf.mxu2 }
 0x202   : > { %865 = vrot.lane.b32.xlu1 %v840_v1, %s1465_s15  ;;  %867 = vrot.lane.b32.xlu2 %v854_v2, %s1465_s15 }
 0x206   : > { %v992_v5 = vpop.f32.mrf.mxu0  ;;  %v1006_v6 = vpop.f32.mrf.mxu1 }
 0x209   : > { %v622_v7 = vpop.f32.mrf.mxu3  ;;  %v608_v8 = vpop.f32.mrf.mxu2 }
 0x20a   : > { %1015 = vrot.lane.b32.xlu1 %v992_v5, %s1466_s16  ;;  %1017 = vrot.lane.b32.xlu2 %v1006_v6, %s1466_s16  ;;  %v883_v5 = vperm.slane %v1831_v54, 0  ;;  %v884_v6 = vperm.slane %v1831_v54, 1 }
 0x20e   : > { %v994_v9 = vpop.f32.mrf.mxu0  ;;  %v1008_v12 = vpop.f32.mrf.mxu1 }
 0x20f   : > { %1019 = vrot.lane.b32.xlu0 %v994_v9, %s1466_s16 }
 0x211   : > { %v624_v10 = vpop.f32.mrf.mxu3  ;;  %v610_v11 = vpop.f32.mrf.mxu2 }
 0x212   : > { %637 = vrot.lane.b32.xlu1 %v608_v8, %s1467_s17  ;;  %629 = vrot.lane.b32.xlu2 %v622_v7, %s1467_s17  ;;  %v1037_v7 = vperm.slane %v1836_v55, 0  ;;  %v1848_v8 = vld [vmem:[%s1950_s6 + $0x6] sm:$0x3] }
 0x217   : > { %631 = vrot.lane.b32.xlu0 %v624_v10, %s1467_s17 }
 0x219   : > { %v775_v13 = vpop.f32.mrf.mxu3  ;;  %v761_v14 = vpop.f32.mrf.mxu2 }
 0x21a   : > { %1021 = vrot.lane.b32.xlu1 %v1008_v12, %s1466_s16  ;;  %639 = vrot.lane.b32.xlu2 %v610_v11, %s1467_s17 }
 0x21f   : > { %790 = vrot.lane.b32.xlu0 %v761_v14, %s1468_s18 }
 0x221   : > { %v777_v15 = vpop.f32.mrf.mxu3  ;;  %v763_v16 = vpop.f32.mrf.mxu2 }
 0x222   : > { %782 = vrot.lane.b32.xlu1 %v775_v13, %s1468_s18  ;;  %784 = vrot.lane.b32.xlu2 %v777_v15, %s1468_s18 }
 0x229   : > { %v915_v17 = vpop.f32.mrf.mxu2  ;;  %v929_v18 = vpop.f32.mrf.mxu3 }
 0x22a   : > { %792 = vrot.lane.b32.xlu1 %v763_v16, %s1468_s18  ;;  %938 = vrot.lane.b32.xlu0 %v915_v17, %s1469_s28  ;;  %v1038_v16 = vperm.slane %v1836_v55, 1 }
 0x231   : > { %v917_v19 = vpop.f32.mrf.mxu2  ;;  %v931_v20 = vpop.f32.mrf.mxu3 }
 0x232   : > { %940 = vrot.lane.b32.xlu1 %v929_v18, %s1469_s28  ;;  %944 = vrot.lane.b32.xlu0 %v931_v20, %s1469_s28  ;;  %v807_v20 = vperm.slane %v1848_v8, 1 }
 0x233   : > { %942 = vrot.lane.b32.xlu2 %v917_v19, %s1469_s28  ;;  %v806_v19 = vperm.slane %v1848_v8, 0 }
 0x239   : > { %v1083_v21 = vpop.f32.mrf.mxu3  ;;  %v1069_v22 = vpop.f32.mrf.mxu2 }
 0x23a   : > { %1094 = vrot.lane.b32.xlu0 %v1083_v21, %s1470_s19 }
 0x23b   : > { %1092 = vrot.lane.b32.xlu2 %v1069_v22, %s1470_s19 }
 0x241   : > { %v1071_v23 = vpop.f32.mrf.mxu2  ;;  %v1085_v24 = vpop.f32.mrf.mxu3 }
 0x242   : > { %1096 = vrot.lane.b32.xlu1 %v1071_v23, %s1470_s19  ;;  %v714_v25 = vpop.permute.xlu2 %713 }
 0x243   : > { %1098 = vrot.lane.b32.xlu2 %v1085_v24, %s1470_s19 }
 0x24c   : > { %v524_v28 = vpop.permute.xlu2 %523 }
 0x254   : > { %v1797_v31 = vpop.permute.xlu2 %861 }
 0x259   : > { %v706_v26 = vpop.permute.xlu0 %705 }
 0x25a   : > { %v718_v13 = vsel %vm717_vm4, %v714_v25, %v706_v26  ;;  %v724_v14 = vsel %vm717_vm4, %v706_v26, %v714_v25 }
 0x25c   : > { %v522_v27 = vpop.permute.xlu1 %521  ;;  %v1801_v34 = vpop.permute.xlu2 %867 }
 0x261   : > { %v530_v30 = vpop.permute.xlu0 %529 }
 0x262   : > { %v540_v50 = vsel %vm533_vm3, %v522_v27, %v530_v30  ;;  %v534_v53 = vsel %vm533_vm3, %v530_v30, %v522_v27  ;;  %v734_v30 = vmul.f32 %v730_v62, %v718_v13 }
 0x263   : > { %v548_v58 = vmul.f32 %v544_v47, %v540_v50  ;;  %v549_v1 = vmul.f32 %v545_v49, %v534_v53 }
 0x264   : > { %v1795_v29 = vpop.permute.xlu1 %707  ;;  %v1807_v37 = vpop.permute.xlu2 %1017 }
 0x265   : > { %v570_v15 = vadd.f32 %v1789_v0, %v548_v58  ;;  %v584_v17 = vadd.f32 %v1787_v63, %v549_v1 }
 0x269   : > { %v1799_v33 = vpop.permute.xlu0 %715 }
 0x26a   : > { %v725_v22 = vsel %vm717_vm4, %v1795_v29, %v1799_v33 }
 0x26b   : > { %v735_v45 = vmul.f32 %v729_v61, %v725_v22 }
 0x26c   : > { %v532_v32 = vpop.permute.xlu1 %531  ;;  %v630_v41 = vpop.permute.xlu2 %629 }
 0x26d   : > { %v541_v9 = vsel %vm533_vm3, %v524_v28, %v532_v32  ;;  %v535_v18 = vsel %vm533_vm3, %v532_v32, %v524_v28  ;;  %v733_v28 = vmul.f32 %v729_v61, %v724_v14  ;;  %v719_v32 = vsel %vm717_vm4, %v1799_v33, %v1795_v29  ;;  %v1324_v14 = vld [vmem:[%s1950_s6 + $0x10] sm:$0x3] }
 0x26e   : > { %v550_v23 = vmul.f32 %v544_v47, %v541_v9  ;;  %v736_v61 = vmul.f32 %v730_v62, %v719_v32 }
 0x270   : > { %v572_v50 = vadd.f32 %v1793_v4, %v550_v23 }
 0x271   : > { %v1805_v36 = vpop.permute.xlu0 %863 }
 0x274   : > { %v1803_v35 = vpop.permute.xlu1 %865  ;;  %v640_v44 = vpop.permute.xlu2 %639 }
 0x27c   : > { %v1809_v38 = vpop.permute.xlu1 %1015  ;;  %v785_v2 = vpop.permute.xlu2 %784 }
 0x281   : > { %v1811_v39 = vpop.permute.xlu0 %1019 }
 0x284   : > { %v638_v40 = vpop.permute.xlu1 %637 }
 0x285   : > { %v641_v59 = vsel %vm401_vm1, %v638_v40, %v630_v41  ;;  %v647_v60 = vsel %vm401_vm1, %v630_v41, %v638_v40  ;;  %v551_v40 = vmul.f32 %v545_v49, %v535_v18  ;;  %v1306_v41 = vld [vmem:[%s1950_s6 + $0xc] sm:$0x3] }
 0x286   : > { %v656_v10 = vmul.f32 %v652_v56, %v647_v60  ;;  %v657_v11 = vmul.f32 %v653_v57, %v641_v59  ;;  %v960_v33 = vperm.slane %v1306_v41, 0  ;;  %v961_v49 = vperm.slane %v1306_v41, 1 }
 0x287   : > { %v586_v58 = vadd.f32 %v1791_v3, %v551_v40  ;;  %v878_v59 = vsel %vm869_vm5, %v1805_v36, %v1797_v31 }
 0x288   : > { %v660_v25 = vadd.f32 %v656_v10, %v570_v15  ;;  %v661_v26 = vadd.f32 %v657_v11, %v584_v17  ;;  %v879_v15 = vsel %vm869_vm5, %v1801_v34, %v1803_v35 }
 0x289   : > { %v632_v42 = vpop.permute.xlu0 %631 }
 0x28a   : > { %v642_v63 = vsel %vm401_vm1, %v640_v44, %v632_v42  ;;  %v648_v27 = vsel %vm401_vm1, %v632_v42, %v640_v44  ;;  %v870_v42 = vsel %vm869_vm5, %v1797_v31, %v1805_v36  ;;  %v738_v52 = vadd.f32 %v734_v30, %v661_v26 }
 0x28b   : > { %v658_v44 = vmul.f32 %v652_v56, %v648_v27  ;;  %v737_v29 = vadd.f32 %v733_v28, %v660_v25  ;;  %v887_v56 = vmul.f32 %v883_v5, %v870_v42  ;;  %v888_v31 = vmul.f32 %v884_v6, %v878_v59 }
 0x28c   : > { %v1813_v43 = vpop.permute.xlu1 %1021  ;;  %v871_v36 = vsel %vm869_vm5, %v1803_v35, %v1801_v34  ;;  %v1115_v25 = vperm.slane %v1324_v14, 1 }
 0x28d   : > { %v943_v48 = vpop.permute.xlu2 %942  ;;  %v662_v9 = vadd.f32 %v658_v44, %v572_v50  ;;  %v889_v28 = vmul.f32 %v883_v5, %v871_v36 }
 0x291   : > { %v791_v51 = vpop.permute.xlu0 %790 }
 0x294   : > { %v783_v46 = vpop.permute.xlu1 %782 }
 0x295   : > { %v795_v24 = vsel %vm794_vm6, %v791_v51, %v783_v46  ;;  %v801_v0 = vsel %vm794_vm6, %v783_v46, %v791_v51  ;;  %v659_v51 = vmul.f32 %v653_v57, %v642_v63  ;;  %v1093_v27 = vpop.permute.xlu2 %1092 }
 0x296   : > { %v810_v47 = vmul.f32 %v806_v19, %v801_v0  ;;  %v811_v46 = vmul.f32 %v807_v20, %v795_v24  ;;  %v739_v24 = vadd.f32 %v735_v45, %v662_v9  ;;  %v1114_v0 = vperm.slane %v1324_v14, 0 }
 0x297   : > { %v663_v10 = vadd.f32 %v659_v51, %v586_v58  ;;  %v1025_v51 = vsel %vm1023_vm7, %v1811_v39, %v1813_v43 }
 0x298   : > { %v814_v57 = vadd.f32 %v810_v47, %v737_v29  ;;  %v815_v1 = vadd.f32 %v811_v46, %v738_v52  ;;  %v1033_v52 = vsel %vm1023_vm7, %v1813_v43, %v1811_v39 }
 0x299   : > { %v740_v23 = vadd.f32 %v736_v61, %v663_v10 }
 0x29a   : > { %v891_v22 = vadd.f32 %v887_v56, %v814_v57 }
 0x29c   : > { %v793_v12 = vpop.permute.xlu1 %792  ;;  %v939_v21 = vpop.permute.xlu0 %938 }
 0x29d   : > { %v796_v11 = vsel %vm794_vm6, %v793_v12, %v785_v2  ;;  %v802_v3 = vsel %vm794_vm6, %v785_v2, %v793_v12  ;;  %v1024_v2 = vsel %vm1023_vm7, %v1809_v38, %v1807_v37  ;;  %v1032_v12 = vsel %vm1023_vm7, %v1807_v37, %v1809_v38  ;;  %v1099_v58 = vpop.permute.xlu2 %1098 }
 0x29e   : > { %v812_v17 = vmul.f32 %v806_v19, %v802_v3  ;;  %v813_v18 = vmul.f32 %v807_v20, %v796_v11  ;;  %v890_v37 = vmul.f32 %v884_v6, %v879_v15  ;;  %v1041_v38 = vmul.f32 %v1037_v7, %v1024_v2 }
 0x29f   : > { %v1042_v19 = vmul.f32 %v1038_v16, %v1032_v12 }
 0x2a0   : > { %v816_v20 = vadd.f32 %v812_v17, %v739_v24  ;;  %v817_v30 = vadd.f32 %v813_v18, %v740_v23 }
 0x2a2   : > { %v893_v50 = vadd.f32 %v889_v28, %v816_v20 }
 0x2a4   : > { %v941_v53 = vpop.permute.xlu1 %940  ;;  %v945_v8 = vpop.permute.xlu0 %944 }
 0x2a5   : > { %v947_v60 = vsel %vm946_vm8, %v939_v21, %v941_v53  ;;  %v955_v4 = vsel %vm946_vm8, %v941_v53, %v939_v21  ;;  %v892_v21 = vadd.f32 %v888_v31, %v815_v1  ;;  %v948_v34 = vsel %vm946_vm8, %v943_v48, %v945_v8 }
 0x2a6   : > { %v964_v62 = vmul.f32 %v960_v33, %v947_v60  ;;  %v965_v13 = vmul.f32 %v961_v49, %v955_v4  ;;  %v956_v35 = vsel %vm946_vm8, %v945_v8, %v943_v48  ;;  %v966_v40 = vmul.f32 %v960_v33, %v948_v34 }
 0x2a7   : > { %v967_v41 = vmul.f32 %v961_v49, %v956_v35  ;;  %v894_v48 = vadd.f32 %v890_v37, %v817_v30  ;;  %v1043_v49 = vmul.f32 %v1037_v7, %v1025_v51  ;;  %v1044_v53 = vmul.f32 %v1038_v16, %v1033_v52 }
 0x2a8   : > { %v968_v26 = vadd.f32 %v964_v62, %v891_v22  ;;  %v969_v63 = vadd.f32 %v965_v13, %v892_v21  ;;  %v970_v29 = vadd.f32 %v966_v40, %v893_v50 }
 0x2a9   : > { %v971_v33 = vadd.f32 %v967_v41, %v894_v48 }
 0x2aa   : > { %v1046_v47 = vadd.f32 %v1042_v19, %v969_v63  ;;  %v1045_v54 = vadd.f32 %v1041_v38, %v968_v26  ;;  %v1047_v39 = vadd.f32 %v1043_v49, %v970_v29 }
 0x2ab   : > { %v1048_v61 = vadd.f32 %v1044_v53, %v971_v33 }
 0x2ac   : > { %v1095_v32 = vpop.permute.xlu0 %1094 }
 0x2ad   : > { %v1101_v45 = vsel %vm1100_vm9, %v1093_v27, %v1095_v32  ;;  %v1109_v5 = vsel %vm1100_vm9, %v1095_v32, %v1093_v27 }
 0x2ae   : > { %v1118_v6 = vmul.f32 %v1114_v0, %v1101_v45  ;;  %v1119_v46 = vmul.f32 %v1115_v25, %v1109_v5 }
 0x2b0   : > { %v1122_v42 = vadd.f32 %v1118_v6, %v1045_v54  ;;  %v1123_v44 = vadd.f32 %v1119_v46, %v1046_v47 }
 0x2b2   : > { %1126 = vst [vmem:[%s1615_s27] sm:$0xff] %v1122_v42 }
 0x2b3   : > { %1127 = vst [vmem:[%s1615_s27 + $0x8] sm:$0xff] %v1123_v44 }
 0x2b4   : > { %v1097_v59 = vpop.permute.xlu1 %1096 }
 0x2b5   : > { %v1102_v60 = vsel %vm1100_vm9, %v1097_v59, %v1099_v58  ;;  %v1110_v4 = vsel %vm1100_vm9, %v1099_v58, %v1097_v59 }
 0x2b6   : > { %v1120_v43 = vmul.f32 %v1114_v0, %v1102_v60  ;;  %v1121_v56 = vmul.f32 %v1115_v25, %v1110_v4 }
 0x2b8   : > { %v1124_v57 = vadd.f32 %v1120_v43, %v1047_v39  ;;  %v1125_v1 = vadd.f32 %v1121_v56, %v1048_v61 }
 0x2ba   : > { %1128 = vst [vmem:[%s1615_s27 + $0x10] sm:$0xf] %v1124_v57 }
 0x2bb   : > { %1129 = vst [vmem:[%s1615_s27 + $0x18] sm:$0xf] %v1125_v1 }
 0x2bc PF: > { %p17_p7 = scmp.ge.s32.totalorder %s1533_s29, 4   ;;  %s1955_s24 = smov %s1450_s25 }
 0x2bd   : > { %s1956_s25 = smov %s1454_s26  ;;  %s1957_s26 = smov %s1543_s9 }
 0x2be   : > { %s1958_s27 = smov %s1533_s29  ;;  %19 = sbr.rel (!%p17_p7) target bundleno = 3 (0x3), region = 103 }
 0x2c3   :  { %1174 = vsyncpa [#allocation3], 1 }
 0x2c4   :  { %1176 = vsyncpa [#allocation3 + $0x1], 1 }

</bundles_post_ra>
